<compile_context>
chip_gen: v7x
topology: tpu7x:2x2x1
jax: 0.10.0
libtpu: 0.0.40
codegen_flags: <defaults>
</compile_context>

<pallas_src>
import functools

import jax
import jax.numpy as jnp
from jax.experimental import pallas as pl
from jax.experimental.pallas import tpu as pltpu


def _conv1x1_kernel(x_ref, w_ref, b_ref, o_ref, acc_ref, *, precision):
    """One (batch, pixel-tile, k-tile) grid step of out = W @ X + b."""
    # x_ref  : (1, t_k, t_px)    input-channel slab, pixels on the lane axis
    # w_ref  : (C_out, t_k)      weight slab in torch (C_out, C_in) layout
    # b_ref  : (C_out, 1)        bias column, broadcast along lanes
    # o_ref  : (1, C_out, t_px)  lane-dense output tile (resident across k)
    # acc_ref: (C_out, t_px)     f32 accumulator scratch (explicit, budgeted)
    k = pl.program_id(2)

    @pl.when(k == 0)
    def _init():
        acc_ref[...] = jnp.zeros_like(acc_ref)

    acc_ref[...] += jnp.dot(
        w_ref[...], x_ref[0],
        preferred_element_type=jnp.float32,
        precision=precision,
    )

    @pl.when(k == pl.num_programs(2) - 1)
    def _finalize():
        out = acc_ref[...] + b_ref[...].astype(jnp.float32)  # element-wise in f32
        o_ref[0] = out.astype(o_ref.dtype)


def _vmem_policy():
    """(vmem_limit_bytes, tile_budget_bytes) derived from this chip's VMEM."""
    phys = 64 * 1024 * 1024          # conservative fallback (v7x per-TC VMEM)
    try:
        phys = int(getattr(pltpu.get_tpu_info(), "vmem_capacity_bytes", phys))
    except Exception:                 # pragma: no cover - info query best-effort
        pass
    # Leave ~32 MiB headroom for Mosaic internal scratch and the pipeline itself.
    # v5e/v6e (128 MiB) -> 96 MiB limit; v7x (64 MiB) -> 32 MiB limit.
    limit = max(32 * 1024 * 1024, min(96 * 1024 * 1024, phys - 32 * 1024 * 1024))
    budget = (2 * limit) // 3        # what the explicit tiles may consume
    return limit, budget


def _pick_k_tile(C_in, C_out, itemsize, budget):
    """C_in (contraction) tile: full C_in unless the weight would hog VMEM."""
    if C_in % 128 != 0 or C_out * C_in * itemsize <= budget // 4:
        return C_in, 1
    t_k = C_in
    while t_k > 128 and (2 * C_out * t_k * itemsize > budget // 4
                         or C_in % t_k != 0):
        t_k -= 128
    # t_k is a multiple of 128 and divides C_in (128 always does when C_in%128==0),
    # so every K block is fully in-bounds and the accumulation stays exact.
    # TODO(synk): also tile C_out for gargantuan weights (C_out*128 tile > budget/8).
    return t_k, C_in // t_k


def _pick_pixel_tile(P, t_k, C_out, itemsize, budget, w_bufs,
                     x_bufs=2, o_bufs=2):
    """Largest 128-aligned pixel tile that fits the VMEM budget (no hard cap)."""
    fixed = w_bufs * C_out * t_k * itemsize + C_out * itemsize    # weight + bias
    per_px = (x_bufs * t_k * itemsize       # pipelined x tiles
              + o_bufs * C_out * itemsize   # pipelined out tiles
              + 4 * C_out)                  # f32 accumulator scratch (1 buffer)
    avail = max(budget - fixed, 128 * per_px)
    t = avail // per_px
    if t >= P:
        return P, 1                          # full-extent block is always legal
    t = max(128, (t // 128) * 128)
    return t, pl.cdiv(P, t)


def conv2d_1x1(x_nchw, weight, bias):
    """1x1 conv with the semantics of torch.nn.Conv2d(C_in, C_out, kernel_size=1).

    x_nchw : (N, C_in, H, W)
    weight : (C_out, C_in, 1, 1)   -- torch layout
    bias   : (C_out,)
    returns: (N, C_out, H, W)
    """
    N, C_in, H, W = x_nchw.shape
    C_out = weight.shape[0]
    P = H * W

    x3 = x_nchw.reshape(N, C_in, P)        # layout-free views, no data movement
    w_mat = weight.reshape(C_out, C_in)    # used as-is: out = W @ X
    b_col = bias.reshape(C_out, 1)

    itemsize = jnp.dtype(x_nchw.dtype).itemsize
    vmem_limit, budget = _vmem_policy()

    t_k, n_k = _pick_k_tile(C_in, C_out, itemsize, budget)
    w_bufs = 1 if n_k == 1 else 2          # grid-invariant weight -> 1 buffer
    t_px, n_px = _pick_pixel_tile(P, t_k, C_out, itemsize, budget, w_bufs)

    # v7x shards the "parallel" grid axes over its 2 TensorCores; guarantee at
    # least 2 program instances (negligible cost on single-TC v5e/v6e).
    if N * n_px < 2 and P > 256:
        t_px = 128 * pl.cdiv(pl.cdiv(P, 2), 128)
        n_px = pl.cdiv(P, t_px)

    # torch-f32 parity: full-precision MXU passes for f32 inputs (free while the
    # kernel is HBM-bound). bf16 inputs keep the native single-pass path.
    want_precision = (jax.lax.Precision.HIGHEST
                      if jnp.dtype(x_nchw.dtype) == jnp.float32 else None)

    cost = pl.CostEstimate(
        flops=2 * N * P * C_in * C_out,
        transcendentals=0,
        bytes_accessed=itemsize * (N * P * C_in + C_in * C_out + C_out
                                   + N * P * C_out),
    )

    def _call(single_buffer_consts, precision):
        const_kw = ({"pipeline_mode": pl.Buffered(1)}
                    if single_buffer_consts else {})
        w_kw = const_kw if n_k == 1 else {}   # weight varies along k when K-tiled
        # TODO(synk): sweep pl.Buffered(3) on the x/out specs for tiny channel
        # counts, and add a batch tile (TN, C, P) for small-P / large-N shapes.
        return pl.pallas_call(
            functools.partial(_conv1x1_kernel, precision=precision),
            out_shape=jax.ShapeDtypeStruct((N, C_out, P), x_nchw.dtype),
            grid_spec=pltpu.PrefetchScalarGridSpec(
                num_scalar_prefetch=0,
                grid=(N, n_px, n_k),
                in_specs=[
                    pl.BlockSpec((1, t_k, t_px), lambda n, p, k: (n, k, p)),
                    pl.BlockSpec((C_out, t_k), lambda n, p, k: (0, k), **w_kw),
                    pl.BlockSpec((C_out, 1), lambda n, p, k: (0, 0), **const_kw),
                ],
                out_specs=pl.BlockSpec((1, C_out, t_px),
                                       lambda n, p, k: (n, 0, p)),
                scratch_shapes=[pltpu.VMEM((C_out, t_px), jnp.float32)],
            ),
            compiler_params=pltpu.CompilerParams(
                dimension_semantics=("parallel", "parallel", "arbitrary"),
                vmem_limit_bytes=vmem_limit,
            ),
            cost_estimate=cost,
        )(x3, w_mat, b_col)

    # Preferred config first; degrade gracefully if pl.Buffered(1) or
    # precision=HIGHEST is rejected by the installed Pallas/Mosaic version.
    attempts = [(True, want_precision), (False, want_precision), (False, None)]
    out3 = None
    last_err = None
    for single_buf, prec in attempts:
        try:
            out3 = _call(single_buf, prec)
            break
        except Exception as e:      # noqa: BLE001 - fall back to a safer config
            last_err = e
    if out3 is None:
        raise last_err

    return out3.reshape(N, C_out, H, W)    # layout-free view back to NCHW


if __name__ == "__main__":
    # Small deterministic example consistent with the module.
    N, C_in, C_out, H, W = 2, 4, 8, 16, 16

    key = jax.random.PRNGKey(0)
    kx, kw, kb = jax.random.split(key, 3)

    x = jax.random.normal(kx, (N, C_in, H, W), dtype=jnp.float32)
    # Deterministic init mimicking nn.Conv2d default (uniform in +-1/sqrt(fan_in)).
    fan_in = C_in * 1 * 1
    bound = 1.0 / (fan_in ** 0.5)
    weight = jax.random.uniform(kw, (C_out, C_in, 1, 1), jnp.float32, -bound, bound)
    bias = jax.random.uniform(kb, (C_out,), jnp.float32, -bound, bound)

    out = jax.block_until_ready(conv2d_1x1(x, weight, bias))

    # Reference check (pure JAX) for torch 1x1-conv semantics.
    ref = jnp.einsum("nchw,oc->nohw", x, weight.reshape(C_out, C_in),
                     precision=jax.lax.Precision.HIGHEST) \
        + bias[None, :, None, None]

    assert out.shape == (N, C_out, H, W)
    # Loose enough to tolerate a rare fallback to default (bf16-demoted) MXU
    # precision; the expected HIGHEST-precision path agrees to ~1e-6.
    assert jnp.allclose(out, ref, atol=1e-2, rtol=1e-2), float(
        jnp.max(jnp.abs(out - ref)))

    print("KERNEL_OK")
</pallas_src>

<mosaic_0001>
module attributes {stable_mosaic.version = 11 : i64} {
  func.func @_conv1x1_kernel(%arg0: i32, %arg1: i32, %arg2: i32, %arg3: memref<1x4x256xf32, #tpu.memory_space<vmem>>, %arg4: memref<8x4xf32, #tpu.memory_space<vmem>>, %arg5: memref<8x1xf32, #tpu.memory_space<vmem>>, %arg6: memref<1x8x256xf32, #tpu.memory_space<vmem>>, %arg7: memref<8x256xf32, #tpu.memory_space<vmem>>) attributes {dimension_semantics = [#tpu.dimension_semantics<parallel>, #tpu.dimension_semantics<parallel>, #tpu.dimension_semantics<arbitrary>], iteration_bounds = array<i64: 2, 1, 1>, scalar_prefetch = 0 : i64, scratch_operands = 1 : i64, tpu.core_type = #tpu.core_type<tc>, window_params = [{transform_indices = @transform_0, window_bounds = array<i64: 1, 4, 256>}, {pipeline_mode = #tpu.pipeline_mode<synchronous>, transform_indices = @transform_1, window_bounds = array<i64: 8, 4>}, {pipeline_mode = #tpu.pipeline_mode<synchronous>, transform_indices = @transform_2, window_bounds = array<i64: 8, 1>}, {transform_indices = @transform_3, window_bounds = array<i64: 1, 8, 256>}]} {
    %c0_i32 = arith.constant 0 : i32
    %0 = arith.cmpi eq, %arg2, %c0_i32 : i32
    %1 = arith.extui %0 : i1 to i32
    %c0_i32_0 = arith.constant 0 : i32
    %2 = arith.cmpi ne, %1, %c0_i32_0 : i32
    scf.if %2 {
      %cst_11 = arith.constant 0.000000e+00 : f32
      %13 = vector.broadcast %cst_11 : f32 to vector<8x256xf32>
      %c0_12 = arith.constant 0 : index
      %c0_13 = arith.constant 0 : index
      %14 = vector.load %arg7[%c0_12, %c0_13] : memref<8x256xf32, #tpu.memory_space<vmem>>, vector<8x256xf32>
      tpu.vector_store %arg7[%c0_12, %c0_13], %13 {strides = array<i32>} : memref<8x256xf32, #tpu.memory_space<vmem>>, vector<8x256xf32>,
    } else {
    }
    %c0 = arith.constant 0 : index
    %c0_1 = arith.constant 0 : index
    %3 = vector.load %arg7[%c0, %c0_1] : memref<8x256xf32, #tpu.memory_space<vmem>>, vector<8x256xf32>
    %c0_2 = arith.constant 0 : index
    %c0_3 = arith.constant 0 : index
    %4 = vector.load %arg4[%c0_2, %c0_3] : memref<8x4xf32, #tpu.memory_space<vmem>>, vector<8x4xf32>
    %c0_4 = arith.constant 0 : index
    %c0_5 = arith.constant 0 : index
    %c0_6 = arith.constant 0 : index
    %5 = vector.load %arg3[%c0_4, %c0_5, %c0_6] : memref<1x4x256xf32, #tpu.memory_space<vmem>>, vector<1x4x256xf32>
    %6 = vector.shape_cast %5 : vector<1x4x256xf32> to vector<4x256xf32>
    %cst = arith.constant dense<0.000000e+00> : vector<8x256xf32>
    %7 = tpu.matmul %4, %6, %cst {dimension_numbers = #tpu.dot_dimension_numbers<[1], [0], [0], [1], [0, 0, 1, 1], [], []>, precision = #tpu.contract_precision<fp32>} : vector<8x4xf32>, vector<4x256xf32>, vector<8x256xf32> -> vector<8x256xf32>
    %8 = arith.addf %3, %7 : vector<8x256xf32>
    %c0_7 = arith.constant 0 : index
    %c0_8 = arith.constant 0 : index
    %9 = vector.load %arg7[%c0_7, %c0_8] : memref<8x256xf32, #tpu.memory_space<vmem>>, vector<8x256xf32>
    tpu.vector_store %arg7[%c0_7, %c0_8], %8 {strides = array<i32>} : memref<8x256xf32, #tpu.memory_space<vmem>>, vector<8x256xf32>,
    %c0_i32_9 = arith.constant 0 : i32
    %10 = arith.cmpi eq, %arg2, %c0_i32_9 : i32
    %11 = arith.extui %10 : i1 to i32
    %c0_i32_10 = arith.constant 0 : i32
    %12 = arith.cmpi ne, %11, %c0_i32_10 : i32
    scf.if %12 {
      %c0_11 = arith.constant 0 : index
      %c0_12 = arith.constant 0 : index
      %13 = vector.load %arg7[%c0_11, %c0_12] : memref<8x256xf32, #tpu.memory_space<vmem>>, vector<8x256xf32>
      %c0_13 = arith.constant 0 : index
      %c0_14 = arith.constant 0 : index
      %14 = vector.load %arg5[%c0_13, %c0_14] : memref<8x1xf32, #tpu.memory_space<vmem>>, vector<8x1xf32>
      %15 = vector.broadcast %14 : vector<8x1xf32> to vector<8x256xf32>
      %16 = arith.addf %13, %15 : vector<8x256xf32>
      %c0_15 = arith.constant 0 : index
      %c0_16 = arith.constant 0 : index
      %c0_17 = arith.constant 0 : index
      %17 = vector.load %arg6[%c0_15, %c0_16, %c0_17] : memref<1x8x256xf32, #tpu.memory_space<vmem>>, vector<1x8x256xf32>
      %18 = vector.shape_cast %17 : vector<1x8x256xf32> to vector<8x256xf32>
      %19 = vector.shape_cast %16 : vector<8x256xf32> to vector<1x8x256xf32>
      tpu.vector_store %arg6[%c0_15, %c0_16, %c0_17], %19 {strides = array<i32>} : memref<1x8x256xf32, #tpu.memory_space<vmem>>, vector<1x8x256xf32>,
    } else {
    }
    return
  }
  func.func @transform_0(%arg0: i32, %arg1: i32, %arg2: i32) -> (i32, i32, i32) {
    %c0_i32 = arith.constant 0 : i32
    return %arg0, %arg2, %arg1 : i32, i32, i32
  }
  func.func @transform_1(%arg0: i32, %arg1: i32, %arg2: i32) -> (i32, i32) {
    %c0_i32 = arith.constant 0 : i32
    %c0_i32_0 = arith.constant 0 : i32
    return %c0_i32, %arg2 : i32, i32
  }
  func.func @transform_2(%arg0: i32, %arg1: i32, %arg2: i32) -> (i32, i32) {
    %c0_i32 = arith.constant 0 : i32
    %c0_i32_0 = arith.constant 0 : i32
    %c0_i32_1 = arith.constant 0 : i32
    return %c0_i32, %c0_i32_0 : i32, i32
  }
  func.func @transform_3(%arg0: i32, %arg1: i32, %arg2: i32) -> (i32, i32, i32) {
    %c0_i32 = arith.constant 0 : i32
    %c0_i32_0 = arith.constant 0 : i32
    return %arg0, %c0_i32, %arg1 : i32, i32, i32
  }
}

module attributes {stable_mosaic.version = 11 : i64} {
  func.func @_conv1x1_kernel(%arg0: i32, %arg1: i32, %arg2: i32, %arg3: memref<1x4x256xf32, #tpu.memory_space<vmem>>, %arg4: memref<8x4xf32, #tpu.memory_space<vmem>>, %arg5: memref<8x1xf32, #tpu.memory_space<vmem>>, %arg6: memref<1x8x256xf32, #tpu.memory_space<vmem>>, %arg7: memref<8x256xf32, #tpu.memory_space<vmem>>) attributes {dimension_semantics = [#tpu.dimension_semantics<parallel>, #tpu.dimension_semantics<parallel>, #tpu.dimension_semantics<arbitrary>], iteration_bounds = array<i64: 2, 1, 1>, scalar_prefetch = 0 : i64, scratch_operands = 1 : i64, tpu.core_type = #tpu.core_type<tc>, window_params = [{transform_indices = @transform_0, window_bounds = array<i64: 1, 4, 256>}, {transform_indices = @transform_1, window_bounds = array<i64: 8, 4>}, {pipeline_mode = #tpu.pipeline_mode<synchronous>, transform_indices = @transform_2, window_bounds = array<i64: 8, 1>}, {transform_indices = @transform_3, window_bounds = array<i64: 1, 8, 256>}]} {
    %c0_i32 = arith.constant 0 : i32
    %0 = arith.cmpi eq, %arg2, %c0_i32 : i32
    %1 = arith.extui %0 : i1 to i32
    %c0_i32_0 = arith.constant 0 : i32
    %2 = arith.cmpi ne, %1, %c0_i32_0 : i32
    scf.if %2 {
      %cst_11 = arith.constant 0.000000e+00 : f32
      %13 = vector.broadcast %cst_11 : f32 to vector<8x256xf32>
      %c0_12 = arith.constant 0 : index
      %c0_13 = arith.constant 0 : index
      %14 = vector.load %arg7[%c0_12, %c0_13] : memref<8x256xf32, #tpu.memory_space<vmem>>, vector<8x256xf32>
      tpu.vector_store %arg7[%c0_12, %c0_13], %13 {strides = array<i32>} : memref<8x256xf32, #tpu.memory_space<vmem>>, vector<8x256xf32>,
    } else {
    }
    %c0 = arith.constant 0 : index
    %c0_1 = arith.constant 0 : index
    %3 = vector.load %arg7[%c0, %c0_1] : memref<8x256xf32, #tpu.memory_space<vmem>>, vector<8x256xf32>
    %c0_2 = arith.constant 0 : index
    %c0_3 = arith.constant 0 : index
    %4 = vector.load %arg4[%c0_2, %c0_3] : memref<8x4xf32, #tpu.memory_space<vmem>>, vector<8x4xf32>
    %c0_4 = arith.constant 0 : index
    %c0_5 = arith.constant 0 : index
    %c0_6 = arith.constant 0 : index
    %5 = vector.load %arg3[%c0_4, %c0_5, %c0_6] : memref<1x4x256xf32, #tpu.memory_space<vmem>>, vector<1x4x256xf32>
    %6 = vector.shape_cast %5 : vector<1x4x256xf32> to vector<4x256xf32>
    %cst = arith.constant dense<0.000000e+00> : vector<8x256xf32>
    %7 = tpu.matmul %4, %6, %cst {dimension_numbers = #tpu.dot_dimension_numbers<[1], [0], [0], [1], [0, 0, 1, 1], [], []>, precision = #tpu.contract_precision<fp32>} : vector<8x4xf32>, vector<4x256xf32>, vector<8x256xf32> -> vector<8x256xf32>
    %8 = arith.addf %3, %7 : vector<8x256xf32>
    %c0_7 = arith.constant 0 : index
    %c0_8 = arith.constant 0 : index
    %9 = vector.load %arg7[%c0_7, %c0_8] : memref<8x256xf32, #tpu.memory_space<vmem>>, vector<8x256xf32>
    tpu.vector_store %arg7[%c0_7, %c0_8], %8 {strides = array<i32>} : memref<8x256xf32, #tpu.memory_space<vmem>>, vector<8x256xf32>,
    %c0_i32_9 = arith.constant 0 : i32
    %10 = arith.cmpi eq, %arg2, %c0_i32_9 : i32
    %11 = arith.extui %10 : i1 to i32
    %c0_i32_10 = arith.constant 0 : i32
    %12 = arith.cmpi ne, %11, %c0_i32_10 : i32
    scf.if %12 {
      %c0_11 = arith.constant 0 : index
      %c0_12 = arith.constant 0 : index
      %13 = vector.load %arg7[%c0_11, %c0_12] : memref<8x256xf32, #tpu.memory_space<vmem>>, vector<8x256xf32>
      %c0_13 = arith.constant 0 : index
      %c0_14 = arith.constant 0 : index
      %14 = vector.load %arg5[%c0_13, %c0_14] : memref<8x1xf32, #tpu.memory_space<vmem>>, vector<8x1xf32>
      %15 = vector.broadcast %14 : vector<8x1xf32> to vector<8x256xf32>
      %16 = arith.addf %13, %15 : vector<8x256xf32>
      %c0_15 = arith.constant 0 : index
      %c0_16 = arith.constant 0 : index
      %c0_17 = arith.constant 0 : index
      %17 = vector.load %arg6[%c0_15, %c0_16, %c0_17] : memref<1x8x256xf32, #tpu.memory_space<vmem>>, vector<1x8x256xf32>
      %18 = vector.shape_cast %17 : vector<1x8x256xf32> to vector<8x256xf32>
      %19 = vector.shape_cast %16 : vector<8x256xf32> to vector<1x8x256xf32>
      tpu.vector_store %arg6[%c0_15, %c0_16, %c0_17], %19 {strides = array<i32>} : memref<1x8x256xf32, #tpu.memory_space<vmem>>, vector<1x8x256xf32>,
    } else {
    }
    return
  }
  func.func @transform_0(%arg0: i32, %arg1: i32, %arg2: i32) -> (i32, i32, i32) {
    %c0_i32 = arith.constant 0 : i32
    return %arg0, %arg2, %arg1 : i32, i32, i32
  }
  func.func @transform_1(%arg0: i32, %arg1: i32, %arg2: i32) -> (i32, i32) {
    %c0_i32 = arith.constant 0 : i32
    %c0_i32_0 = arith.constant 0 : i32
    return %c0_i32, %arg2 : i32, i32
  }
  func.func @transform_2(%arg0: i32, %arg1: i32, %arg2: i32) -> (i32, i32) {
    %c0_i32 = arith.constant 0 : i32
    %c0_i32_0 = arith.constant 0 : i32
    %c0_i32_1 = arith.constant 0 : i32
    return %c0_i32, %c0_i32_0 : i32, i32
  }
  func.func @transform_3(%arg0: i32, %arg1: i32, %arg2: i32) -> (i32, i32, i32) {
    %c0_i32 = arith.constant 0 : i32
    %c0_i32_0 = arith.constant 0 : i32
    return %arg0, %c0_i32, %arg1 : i32, i32, i32
  }
}

module attributes {stable_mosaic.version = 11 : i64} {
  func.func @_conv1x1_kernel(%arg0: i32, %arg1: i32, %arg2: i32, %arg3: memref<1x4x256xf32, #tpu.memory_space<vmem>>, %arg4: memref<8x4xf32, #tpu.memory_space<vmem>>, %arg5: memref<8x1xf32, #tpu.memory_space<vmem>>, %arg6: memref<1x8x256xf32, #tpu.memory_space<vmem>>, %arg7: memref<8x256xf32, #tpu.memory_space<vmem>>) attributes {dimension_semantics = [#tpu.dimension_semantics<parallel>, #tpu.dimension_semantics<parallel>, #tpu.dimension_semantics<arbitrary>], iteration_bounds = array<i64: 2, 1, 1>, scalar_prefetch = 0 : i64, scratch_operands = 1 : i64, tpu.core_type = #tpu.core_type<tc>, window_params = [{transform_indices = @transform_0, window_bounds = array<i64: 1, 4, 256>}, {transform_indices = @transform_1, window_bounds = array<i64: 8, 4>}, {pipeline_mode = #tpu.pipeline_mode<synchronous>, transform_indices = @transform_2, window_bounds = array<i64: 8, 1>}, {transform_indices = @transform_3, window_bounds = array<i64: 1, 8, 256>}]} {
    %c0_i32 = arith.constant 0 : i32
    %0 = arith.cmpi eq, %arg2, %c0_i32 : i32
    %1 = arith.extui %0 : i1 to i32
    %c0_i32_0 = arith.constant 0 : i32
    %2 = arith.cmpi ne, %1, %c0_i32_0 : i32
    scf.if %2 {
      %cst_11 = arith.constant 0.000000e+00 : f32
      %13 = vector.broadcast %cst_11 : f32 to vector<8x256xf32>
      %c0_12 = arith.constant 0 : index
      %c0_13 = arith.constant 0 : index
      %14 = vector.load %arg7[%c0_12, %c0_13] : memref<8x256xf32, #tpu.memory_space<vmem>>, vector<8x256xf32>
      tpu.vector_store %arg7[%c0_12, %c0_13], %13 {strides = array<i32>} : memref<8x256xf32, #tpu.memory_space<vmem>>, vector<8x256xf32>,
    } else {
    }
    %c0 = arith.constant 0 : index
    %c0_1 = arith.constant 0 : index
    %3 = vector.load %arg7[%c0, %c0_1] : memref<8x256xf32, #tpu.memory_space<vmem>>, vector<8x256xf32>
    %c0_2 = arith.constant 0 : index
    %c0_3 = arith.constant 0 : index
    %4 = vector.load %arg4[%c0_2, %c0_3] : memref<8x4xf32, #tpu.memory_space<vmem>>, vector<8x4xf32>
    %c0_4 = arith.constant 0 : index
    %c0_5 = arith.constant 0 : index
    %c0_6 = arith.constant 0 : index
    %5 = vector.load %arg3[%c0_4, %c0_5, %c0_6] : memref<1x4x256xf32, #tpu.memory_space<vmem>>, vector<1x4x256xf32>
    %6 = vector.shape_cast %5 : vector<1x4x256xf32> to vector<4x256xf32>
    %cst = arith.constant dense<0.000000e+00> : vector<8x256xf32>
    %7 = tpu.matmul %4, %6, %cst {dimension_numbers = #tpu.dot_dimension_numbers<[1], [0], [0], [1], [0, 0, 1, 1], [], []>} : vector<8x4xf32>, vector<4x256xf32>, vector<8x256xf32> -> vector<8x256xf32>
    %8 = arith.addf %3, %7 : vector<8x256xf32>
    %c0_7 = arith.constant 0 : index
    %c0_8 = arith.constant 0 : index
    %9 = vector.load %arg7[%c0_7, %c0_8] : memref<8x256xf32, #tpu.memory_space<vmem>>, vector<8x256xf32>
    tpu.vector_store %arg7[%c0_7, %c0_8], %8 {strides = array<i32>} : memref<8x256xf32, #tpu.memory_space<vmem>>, vector<8x256xf32>,
    %c0_i32_9 = arith.constant 0 : i32
    %10 = arith.cmpi eq, %arg2, %c0_i32_9 : i32
    %11 = arith.extui %10 : i1 to i32
    %c0_i32_10 = arith.constant 0 : i32
    %12 = arith.cmpi ne, %11, %c0_i32_10 : i32
    scf.if %12 {
      %c0_11 = arith.constant 0 : index
      %c0_12 = arith.constant 0 : index
      %13 = vector.load %arg7[%c0_11, %c0_12] : memref<8x256xf32, #tpu.memory_space<vmem>>, vector<8x256xf32>
      %c0_13 = arith.constant 0 : index
      %c0_14 = arith.constant 0 : index
      %14 = vector.load %arg5[%c0_13, %c0_14] : memref<8x1xf32, #tpu.memory_space<vmem>>, vector<8x1xf32>
      %15 = vector.broadcast %14 : vector<8x1xf32> to vector<8x256xf32>
      %16 = arith.addf %13, %15 : vector<8x256xf32>
      %c0_15 = arith.constant 0 : index
      %c0_16 = arith.constant 0 : index
      %c0_17 = arith.constant 0 : index
      %17 = vector.load %arg6[%c0_15, %c0_16, %c0_17] : memref<1x8x256xf32, #tpu.memory_space<vmem>>, vector<1x8x256xf32>
      %18 = vector.shape_cast %17 : vector<1x8x256xf32> to vector<8x256xf32>
      %19 = vector.shape_cast %16 : vector<8x256xf32> to vector<1x8x256xf32>
      tpu.vector_store %arg6[%c0_15, %c0_16, %c0_17], %19 {strides = array<i32>} : memref<1x8x256xf32, #tpu.memory_space<vmem>>, vector<1x8x256xf32>,
    } else {
    }
    return
  }
  func.func @transform_0(%arg0: i32, %arg1: i32, %arg2: i32) -> (i32, i32, i32) {
    %c0_i32 = arith.constant 0 : i32
    return %arg0, %arg2, %arg1 : i32, i32, i32
  }
  func.func @transform_1(%arg0: i32, %arg1: i32, %arg2: i32) -> (i32, i32) {
    %c0_i32 = arith.constant 0 : i32
    %c0_i32_0 = arith.constant 0 : i32
    return %c0_i32, %arg2 : i32, i32
  }
  func.func @transform_2(%arg0: i32, %arg1: i32, %arg2: i32) -> (i32, i32) {
    %c0_i32 = arith.constant 0 : i32
    %c0_i32_0 = arith.constant 0 : i32
    %c0_i32_1 = arith.constant 0 : i32
    return %c0_i32, %c0_i32_0 : i32, i32
  }
  func.func @transform_3(%arg0: i32, %arg1: i32, %arg2: i32) -> (i32, i32, i32) {
    %c0_i32 = arith.constant 0 : i32
    %c0_i32_0 = arith.constant 0 : i32
    return %arg0, %c0_i32, %arg1 : i32, i32, i32
  }
}

</mosaic_0001>

<bundles_post_ra>
// kernel: tpu_custom_call.1
= control target key start
LH: loop header
LB: loop body
LE: loop exit
PB: predicated region body
PF: predicated region fallthrough
CT: control target
= control target key end

     0   :  { %8 = vsyncpa [#allocation4], 0  ;;  %s1166_s0 = inlined_call_operand.vmem [shape: f32[2,4,256], index: 0, kind: input, shape index: {}]   ;;  %s1167_s1 = inlined_call_operand.vmem [shape: f32[8,4], index: 1, kind: input, shape index: {}]   ;;  %s1168_s2 = inlined_call_operand.vmem [shape: f32[8,1], index: 2, kind: input, shape index: {}]   ;;  %s1169_s3 = inlined_call_operand.hbm [shape: f32[2,8,256], index: 3, kind: output, shape index: {}]  }
   0x1   :  { %10 = vsyncpa [#allocation4 + $0x1], 0  ;;  %s1048_s12 = smov 0   ;;  %s1050_s13 = smov 0  }
   0x2   :  { %s1052_s14 = smov 0   ;;  %s1054_s15 = smov 0  }
   0x3   :  { %s1056_s16 = smov 0   ;;  %s1058_s17 = smov 0  }
   0x4 LB: > { %s860_s18 = sadd.s32 4294967295, %s1023_s17   ;;  %s861_s19 = sadd.s32 4294967294, %s1023_s17   ;;  %s1023_s17 = sphi %s1058_s17, %s16_s17   ;;  %s1019_s16 = sphi %s1056_s16, %s1176_s16   ;;  %s1015_s15 = sphi %s1054_s15, %s1175_s15   ;;  %s1011_s14 = sphi %s1052_s14, %s1174_s14   ;;  %s1007_s13 = sphi %s1050_s13, %s1173_s13   ;;  %s1003_s12 = sphi %s1048_s12, %s1172_s12  }
   0x5   : > { %s35_s20 = sadd.s32 1, %s1019_s16  ;;  %s121_s21 = sadd.s32 1, %s1011_s14 }
   0x6   : > { %p37_p0 = scmp.ge.s32.totalorder %s35_s20, 2  ;;  %p131_p1 = scmp.ne.s32.totalorder %s1011_s14, %s1007_s13 }
   0x7   : > { %p132_p2 = scmp.eq.s32.totalorder %s860_s18, 1  ;;  %p137_p3 = scmp.ne.s32.totalorder %s1007_s13, %s1003_s12 }
   0x8   : > { %s1178_s20 = smov (%p37_p0, %s35_s20), 0  ;;  %p138_p5 = scmp.eq.s32.totalorder %s861_s19, 1 }
   0x9   : > { %p1088_p4 = por %p132_p2, %p131_p1  ;;  %s116_s23 = ssub.s32 %s1019_s16, %s1178_s20 }
   0xa   : > { %p865_p6 = scmp.ge.s32.totalorder %s1023_s17, 1  ;;  %p119_p7 = scmp.eq.s32.totalorder %s116_s23, 0 }
   0xb   : > { %p1095_p8 = por %p138_p5, %p137_p3  ;;  %p183_p9 = scmp.lt.s32.totalorder %s1023_s17, 3 }
   0xc   : > { %s1101_s25 = scalar_select %p119_p7, %s1011_s14, %s121_s21  }
   0xd   : > { %p184_p10 = pnand %p865_p6, %p183_p9 }
   0xe   : > { %p220_p11 = scmp.lt.s32.totalorder (!%p184_p10), %s1015_s15, 1  ;;  %v246_v0 = vld [vmem:[%s1167_s1] sm:$0xff] (!%p184_p10)  ;;  %vm250_vm0 = vcmask (!%p184_p10), 31744   ;;  %v1025_v1 = vmov (!%p184_p10), 0.0   ;;  %v1026_v5 = vmov (!%p184_p10), 0   ;;  %vm254_vm1 = vcmask (!%p184_p10), 1043456  }
   0xf   : > { %187 = sbr.rel (%p184_p10) target bundleno = 281 (0x119), region = 32  ;;  %325 = vmatprep.mubr.f32.mxu1 (!%p184_p10), %v1025_v1  ;;  %562 = vmatprep.mubr.f32.mxu0 (!%p184_p10), %v1025_v1  ;;  %v252_v2 = vsel (!%p184_p10), %vm250_vm0, %v246_v0, 0  ;;  %v733_v3 = vld [vmem:[%s1168_s2] sm:$0xff] (!%p184_p10)  ;;  %s216_s8 = sand.u32 (!%p184_p10), 1, %s1007_s13  }
  0x10   : > { %v326_v4 = vand.u32 (!%p184_p10), 4294901760, %v252_v2  ;;  %943 = vset.pattern.permute.xlu0 (!%p184_p10), %v1026_v5  ;;  %s866_s9 = sshll.u32 (!%p184_p10), %s216_s8, 4  ;;  %s875_s10 = sshll.u32 (!%p184_p10), %s1015_s15, 8 }
  0x11   : > { %736 = vperm.xlu0 (!%p184_p10), %943, %v733_v3   ;;  %s218_s11 = scalar_lea.vmem (!%p184_p10), [#allocation3], %s866_s9  ;;  %s1119_s23 = scalar_lea.hbm (!%p184_p10), %s1169_s3, %s875_s10 }
  0x12   : > { %v327_v6 = vsub.f32 (!%p184_p10), %v252_v2, %v326_v4  ;;  %s760_s18 = sshll.u32 (!%p184_p10), %s218_s11, 4  ;;  %s744_s26 = scalar_lea.sflag (!%p184_p10), [#allocation4], %s216_s8  ;;  %s1121_s18 = int_to_ptr.vmem [resolvable:$true] %s760_s18 }
  0x13   : > { %s945_s27 = scalar_lea.vmem (!%p184_p10), %s1121_s18, 256 }
  0x14   : > { %v328_v8 = vand.u32 (!%p184_p10), 4294901760, %v327_v6  ;;  %p946_p12 = scmp.ne.s32.totalorder (!%p184_p10), %s1121_s18, %s945_s27 }
  0x16   : > { %s221_s30 = scalar_select %p220_p11, %s1015_s15, 1  ;;  %v329_v12 = vsub.f32 %v327_v6, %v328_v8 }
  0x17   : > { %p947_p13 = pnand %p946_p12, %p1088_p4  ;;  %s1027_s15 = smov [#allocation3]  }
  0x18   : > { %s874_s4 = sshll.u32 %s221_s30, 3  ;;  %v330_v16 = vand.u32 4294901760, %v329_v12  ;;  %s949_s28 = sshll.u32 %s1027_s15, 4  ;;  %s950_s28 = int_to_ptr.vmem [resolvable:$false] %s949_s28 }
  0x19   : > { %s231_s7 = scalar_lea.vmem %s1166_s0, %s874_s4  ;;  %p948_p0 = pneg %p947_p13 }
  0x1a   : > { %v247_v7 = vld [vmem:[%s231_s7] sm:$0xff]  ;;  %s951_s29 = scalar_lea.vmem %s950_s28, 512  ;;  %p952_p1 = scmp.lt.s32.totalorder %s1121_s18, %s950_s28 }
  0x1b   : > { %v249_v9 = vcombine.high %v247_v7, %v247_v7  ;;  %v255_v10 = vsel %vm254_vm1, %v247_v7, 0  ;;  %p953_p2 = scmp.lt.s32.totalorder %s951_s29, %s945_s27 }
  0x1c   : > { %v261_v11 = vand.u32 4294901760, %v255_v10 }
  0x1d   : > { %v257_v13 = vsel %vm254_vm1, %v249_v9, 0  ;;  %p954_p3 = por %p953_p2, %p952_p1 }
  0x1e   : > { %v259_v14 = vand.u32 4294901760, %v257_v13  ;;  %v344_v15 = vsub.f32 %v255_v10, %v261_v11 }
  0x1f   : > { %p955_p5 = pnand %p954_p3, %p948_p0 }
  0x20   : > { %260 = vmatprep.subr.mxu1 %v259_v14  ;;  %497 = vmatprep.subr.mxu0 %v259_v14  ;;  %v338_v17 = vsub.f32 %v257_v13, %v259_v14  ;;  %v345_v18 = vand.u32 4294901760, %v344_v15 }
  0x21   : > { %262 = vmatpush1.msra.mxu1 %v261_v11  ;;  %499 = vmatpush1.msra.mxu0 %v261_v11 }
  0x22   : > { %331 = vmatmul.mubr.f32.vlgmr.msra.gmra.mrb[0].mxu1 %v330_v16  ;;  %566 = vmatmul.mubr.f32.vlgmr.msra.gmra.mrb[0].mxu0 %v328_v8  ;;  %v339_v19 = vand.u32 4294901760, %v338_v17  ;;  %v346_v20 = vsub.f32 %v344_v15, %v345_v18 }
  0x23   : > { %411 = vmatprep.mubr.f32.mxu1 %v1025_v1  ;;  %642 = vmatprep.mubr.f32.mxu0 %v1025_v1 }
  0x24   : > { %v340_v21 = vsub.f32 %v338_v17, %v339_v19  ;;  %575 = vmatprep.subr.mxu0 %v339_v19  ;;  %v347_v22 = vand.u32 4294901760, %v346_v20 }
  0x25   : > { %579 = vmatpush1.msra.mxu0 %v345_v18 }
  0x26   : > { %v341_v23 = vand.u32 4294901760, %v340_v21  ;;  %651 = vmatprep.subr.mxu0 %v259_v14 }
  0x28   : > { %342 = vmatprep.subr.mxu1 %v341_v23 }
  0x29   : > { %348 = vmatpush1.msra.mxu1 %v347_v22 }
  0x2a   : > { %413 = vmatmul.mubr.f32.vlgmr.msra.gmra.mrb[0].mxu1 %v326_v4  ;;  %644 = vmatmul.mubr.f32.vlgmr.msra.gmra.mrb[0].mxu0 %v326_v4 }
  0x2b   : > { %421 = vmatprep.subr.mxu1 %v338_v17  ;;  %487 = vmatprep.mubr.f32.mxu1 %v1025_v1 }
  0x2c   : > { %424 = vmatpush1.msra.mxu1 %v344_v15  ;;  %653 = vmatpush1.msra.mxu0 %v261_v11 }
  0x2d   : > { %716 = vmatprep.mubr.f32.mxu0 %v1025_v1 }
  0x32   : > { %490 = vmatmul.mubr.f32.vlgmr.msra.gmra.mrb[0].mxu1 %v327_v6  ;;  %718 = vmatmul.mubr.f32.vlgmr.msra.gmra.mrb[0].mxu0 %v326_v4 }
  0x90   : > { %v737_v24 = vpop.permute.xlu0 %736 }
 0x105   : > { %v491_v25 = vpop.f32.mrb[0].mxu1  ;;  %v719_v26 = vpop.f32.mrb[0].mxu0 }
 0x106   : > { %v876_v27 = vadd.f32 %v719_v26, %v491_v25  ;;  %v493_v28 = vpop.f32.mrb[1].mxu1  ;;  %v721_v29 = vpop.f32.mrb[1].mxu0 }
 0x107   : > { %v877_v30 = vadd.f32 %v721_v29, %v493_v28 }
 0x108   : > { %v739_v31 = vadd.f32 %v876_v27, %v737_v24 }
 0x109   : > { %v740_v32 = vadd.f32 %v877_v30, %v737_v24 }
 0x10a   : > { %741 = vst [vmem:[%s218_s11] sm:$0xff] %v739_v31 }
 0x10b   : > { %742 = vst [vmem:[%s218_s11 + $0x8] sm:$0xff] %v740_v32 }
 0x10c   : > { %958 = shalt.err (!%p955_p5)
}
 0x10d   : > { %s959_s30 = scalar_lea.hbm %s1119_s23, 256  ;;  %s963_s6 = scalar_lea.hbm %s1169_s3, 512 }
 0x10e   : > { %p960_p6 = scmp.ne.s32.totalorder %s1119_s23, %s959_s30  ;;  %p964_p10 = scmp.lt.u32.totalorder %s1119_s23, %s1169_s3 }
 0x10f   : > { %p965_p11 = scmp.lt.u32.totalorder %s963_s6, %s959_s30  ;;  %p967_p13 = scmp.lt.u32.totalorder %s959_s30, %s1119_s23 }
 0x110   : > { %p961_p7 = pnand %p960_p6, %p1088_p4 }
 0x111   : > { %p966_p12 = por %p965_p11, %p964_p10 }
 0x112   : > { %p962_p9 = pneg %p961_p7 }
 0x113   : > { %p968_p0 = por %p967_p13, %p966_p12 }
 0x115   : > { %p969_p1 = pnand %p968_p0, %p962_p9 }
 0x117   : > { %972 = shalt.err (!%p969_p1)
}
 0x118   : > { %886 = dma.vmem_to_hbm [thread:$0]  (%p1088_p4), %s1121_s18, 256, %s1119_s23, %s744_s26  }
 0x119 PF: > { %p892_p2 = scmp.ge.s32.totalorder %s1023_s17, 2  ;;  %s772_s9 = sand.u32 1, %s1003_s12  }
 0x11a   : > { %s773_s10 = scalar_lea.sflag [#allocation4], %s772_s9 }
 0x11b   : > { %p889_p3 = pnand %p892_p2, %p1095_p8 }
 0x11d   : > { %998 = dma.done.wait (!%p889_p3), %s773_s10, 256  }
 0x11e   : > { %1000 = vsyncadd (!%p889_p3), %s773_s10, 4294967040  ;;  %s16_s17 = sadd.s32 1, %s1023_s17   ;;  %s1172_s12 = smov %s1007_s13 }
 0x11f   : > { %p13_p5 = scmp.ge.s32.totalorder %s16_s17, 4   ;;  %s1173_s13 = smov %s1011_s14 }
 0x120   : > { %s1174_s14 = smov %s1101_s25  ;;  %s1175_s15 = smov %s1019_s16 }
 0x121   : > { %s1176_s16 = smov %s1178_s20  ;;  %15 = sbr.rel (!%p13_p5) target bundleno = 4 (0x4), region = 78 }
 0x128   :  { %778 = vsyncpa [#allocation4], 1 }
 0x129   :  { %780 = vsyncpa [#allocation4 + $0x1], 1 }

// kernel: tpu_custom_call.1
= control target key start
LH: loop header
LB: loop body
LE: loop exit
PB: predicated region body
PF: predicated region fallthrough
CT: control target
= control target key end

     0   :  { %8 = vsyncpa [#allocation4], 0  ;;  %s1166_s0 = inlined_call_operand.vmem [shape: f32[2,4,256], index: 0, kind: input, shape index: {}]   ;;  %s1167_s1 = inlined_call_operand.vmem [shape: f32[8,4], index: 1, kind: input, shape index: {}]   ;;  %s1168_s2 = inlined_call_operand.vmem [shape: f32[8,1], index: 2, kind: input, shape index: {}]   ;;  %s1169_s3 = inlined_call_operand.hbm [shape: f32[2,8,256], index: 3, kind: output, shape index: {}]  }
   0x1   :  { %10 = vsyncpa [#allocation4 + $0x1], 0  ;;  %s1048_s12 = smov 0   ;;  %s1050_s13 = smov 0  }
   0x2   :  { %s1052_s14 = smov 0   ;;  %s1054_s15 = smov 0  }
   0x3   :  { %s1056_s16 = smov 0   ;;  %s1058_s17 = smov 0  }
   0x4 LB: > { %s860_s18 = sadd.s32 4294967295, %s1023_s17   ;;  %s861_s19 = sadd.s32 4294967294, %s1023_s17   ;;  %s1023_s17 = sphi %s1058_s17, %s16_s17   ;;  %s1019_s16 = sphi %s1056_s16, %s1176_s16   ;;  %s1015_s15 = sphi %s1054_s15, %s1175_s15   ;;  %s1011_s14 = sphi %s1052_s14, %s1174_s14   ;;  %s1007_s13 = sphi %s1050_s13, %s1173_s13   ;;  %s1003_s12 = sphi %s1048_s12, %s1172_s12  }
   0x5   : > { %s35_s20 = sadd.s32 1, %s1019_s16  ;;  %s121_s21 = sadd.s32 1, %s1011_s14 }
   0x6   : > { %p37_p0 = scmp.ge.s32.totalorder %s35_s20, 2  ;;  %p131_p1 = scmp.ne.s32.totalorder %s1011_s14, %s1007_s13 }
   0x7   : > { %p132_p2 = scmp.eq.s32.totalorder %s860_s18, 1  ;;  %p137_p3 = scmp.ne.s32.totalorder %s1007_s13, %s1003_s12 }
   0x8   : > { %s1178_s20 = smov (%p37_p0, %s35_s20), 0  ;;  %p138_p5 = scmp.eq.s32.totalorder %s861_s19, 1 }
   0x9   : > { %p1088_p4 = por %p132_p2, %p131_p1  ;;  %s116_s23 = ssub.s32 %s1019_s16, %s1178_s20 }
   0xa   : > { %p865_p6 = scmp.ge.s32.totalorder %s1023_s17, 1  ;;  %p119_p7 = scmp.eq.s32.totalorder %s116_s23, 0 }
   0xb   : > { %p1095_p8 = por %p138_p5, %p137_p3  ;;  %p183_p9 = scmp.lt.s32.totalorder %s1023_s17, 3 }
   0xc   : > { %s1101_s25 = scalar_select %p119_p7, %s1011_s14, %s121_s21  }
   0xd   : > { %p184_p10 = pnand %p865_p6, %p183_p9 }
   0xe   : > { %p220_p11 = scmp.lt.s32.totalorder (!%p184_p10), %s1015_s15, 1  ;;  %v246_v0 = vld [vmem:[%s1167_s1] sm:$0xff] (!%p184_p10)  ;;  %vm250_vm0 = vcmask (!%p184_p10), 31744   ;;  %v1025_v1 = vmov (!%p184_p10), 0.0   ;;  %v1026_v5 = vmov (!%p184_p10), 0   ;;  %vm254_vm1 = vcmask (!%p184_p10), 1043456  }
   0xf   : > { %187 = sbr.rel (%p184_p10) target bundleno = 281 (0x119), region = 32  ;;  %325 = vmatprep.mubr.f32.mxu1 (!%p184_p10), %v1025_v1  ;;  %562 = vmatprep.mubr.f32.mxu0 (!%p184_p10), %v1025_v1  ;;  %v252_v2 = vsel (!%p184_p10), %vm250_vm0, %v246_v0, 0  ;;  %v733_v3 = vld [vmem:[%s1168_s2] sm:$0xff] (!%p184_p10)  ;;  %s216_s8 = sand.u32 (!%p184_p10), 1, %s1007_s13  }
  0x10   : > { %v326_v4 = vand.u32 (!%p184_p10), 4294901760, %v252_v2  ;;  %943 = vset.pattern.permute.xlu0 (!%p184_p10), %v1026_v5  ;;  %s866_s9 = sshll.u32 (!%p184_p10), %s216_s8, 4  ;;  %s875_s10 = sshll.u32 (!%p184_p10), %s1015_s15, 8 }
  0x11   : > { %736 = vperm.xlu0 (!%p184_p10), %943, %v733_v3   ;;  %s218_s11 = scalar_lea.vmem (!%p184_p10), [#allocation3], %s866_s9  ;;  %s1119_s23 = scalar_lea.hbm (!%p184_p10), %s1169_s3, %s875_s10 }
  0x12   : > { %v327_v6 = vsub.f32 (!%p184_p10), %v252_v2, %v326_v4  ;;  %s760_s18 = sshll.u32 (!%p184_p10), %s218_s11, 4  ;;  %s744_s26 = scalar_lea.sflag (!%p184_p10), [#allocation4], %s216_s8  ;;  %s1121_s18 = int_to_ptr.vmem [resolvable:$true] %s760_s18 }
  0x13   : > { %s945_s27 = scalar_lea.vmem (!%p184_p10), %s1121_s18, 256 }
  0x14   : > { %v328_v8 = vand.u32 (!%p184_p10), 4294901760, %v327_v6  ;;  %p946_p12 = scmp.ne.s32.totalorder (!%p184_p10), %s1121_s18, %s945_s27 }
  0x16   : > { %s221_s30 = scalar_select %p220_p11, %s1015_s15, 1  ;;  %v329_v12 = vsub.f32 %v327_v6, %v328_v8 }
  0x17   : > { %p947_p13 = pnand %p946_p12, %p1088_p4  ;;  %s1027_s15 = smov [#allocation3]  }
  0x18   : > { %s874_s4 = sshll.u32 %s221_s30, 3  ;;  %v330_v16 = vand.u32 4294901760, %v329_v12  ;;  %s949_s28 = sshll.u32 %s1027_s15, 4  ;;  %s950_s28 = int_to_ptr.vmem [resolvable:$false] %s949_s28 }
  0x19   : > { %s231_s7 = scalar_lea.vmem %s1166_s0, %s874_s4  ;;  %p948_p0 = pneg %p947_p13 }
  0x1a   : > { %v247_v7 = vld [vmem:[%s231_s7] sm:$0xff]  ;;  %s951_s29 = scalar_lea.vmem %s950_s28, 512  ;;  %p952_p1 = scmp.lt.s32.totalorder %s1121_s18, %s950_s28 }
  0x1b   : > { %v249_v9 = vcombine.high %v247_v7, %v247_v7  ;;  %v255_v10 = vsel %vm254_vm1, %v247_v7, 0  ;;  %p953_p2 = scmp.lt.s32.totalorder %s951_s29, %s945_s27 }
  0x1c   : > { %v261_v11 = vand.u32 4294901760, %v255_v10 }
  0x1d   : > { %v257_v13 = vsel %vm254_vm1, %v249_v9, 0  ;;  %p954_p3 = por %p953_p2, %p952_p1 }
  0x1e   : > { %v259_v14 = vand.u32 4294901760, %v257_v13  ;;  %v344_v15 = vsub.f32 %v255_v10, %v261_v11 }
  0x1f   : > { %p955_p5 = pnand %p954_p3, %p948_p0 }
  0x20   : > { %260 = vmatprep.subr.mxu1 %v259_v14  ;;  %497 = vmatprep.subr.mxu0 %v259_v14  ;;  %v338_v17 = vsub.f32 %v257_v13, %v259_v14  ;;  %v345_v18 = vand.u32 4294901760, %v344_v15 }
  0x21   : > { %262 = vmatpush1.msra.mxu1 %v261_v11  ;;  %499 = vmatpush1.msra.mxu0 %v261_v11 }
  0x22   : > { %331 = vmatmul.mubr.f32.vlgmr.msra.gmra.mrb[0].mxu1 %v330_v16  ;;  %566 = vmatmul.mubr.f32.vlgmr.msra.gmra.mrb[0].mxu0 %v328_v8  ;;  %v339_v19 = vand.u32 4294901760, %v338_v17  ;;  %v346_v20 = vsub.f32 %v344_v15, %v345_v18 }
  0x23   : > { %411 = vmatprep.mubr.f32.mxu1 %v1025_v1  ;;  %642 = vmatprep.mubr.f32.mxu0 %v1025_v1 }
  0x24   : > { %v340_v21 = vsub.f32 %v338_v17, %v339_v19  ;;  %575 = vmatprep.subr.mxu0 %v339_v19  ;;  %v347_v22 = vand.u32 4294901760, %v346_v20 }
  0x25   : > { %579 = vmatpush1.msra.mxu0 %v345_v18 }
  0x26   : > { %v341_v23 = vand.u32 4294901760, %v340_v21  ;;  %651 = vmatprep.subr.mxu0 %v259_v14 }
  0x28   : > { %342 = vmatprep.subr.mxu1 %v341_v23 }
  0x29   : > { %348 = vmatpush1.msra.mxu1 %v347_v22 }
  0x2a   : > { %413 = vmatmul.mubr.f32.vlgmr.msra.gmra.mrb[0].mxu1 %v326_v4  ;;  %644 = vmatmul.mubr.f32.vlgmr.msra.gmra.mrb[0].mxu0 %v326_v4 }
  0x2b   : > { %421 = vmatprep.subr.mxu1 %v338_v17  ;;  %487 = vmatprep.mubr.f32.mxu1 %v1025_v1 }
  0x2c   : > { %424 = vmatpush1.msra.mxu1 %v344_v15  ;;  %653 = vmatpush1.msra.mxu0 %v261_v11 }
  0x2d   : > { %716 = vmatprep.mubr.f32.mxu0 %v1025_v1 }
  0x32   : > { %490 = vmatmul.mubr.f32.vlgmr.msra.gmra.mrb[0].mxu1 %v327_v6  ;;  %718 = vmatmul.mubr.f32.vlgmr.msra.gmra.mrb[0].mxu0 %v326_v4 }
  0x90   : > { %v737_v24 = vpop.permute.xlu0 %736 }
 0x105   : > { %v491_v25 = vpop.f32.mrb[0].mxu1  ;;  %v719_v26 = vpop.f32.mrb[0].mxu0 }
 0x106   : > { %v876_v27 = vadd.f32 %v719_v26, %v491_v25  ;;  %v493_v28 = vpop.f32.mrb[1].mxu1  ;;  %v721_v29 = vpop.f32.mrb[1].mxu0 }
 0x107   : > { %v877_v30 = vadd.f32 %v721_v29, %v493_v28 }
 0x108   : > { %v739_v31 = vadd.f32 %v876_v27, %v737_v24 }
 0x109   : > { %v740_v32 = vadd.f32 %v877_v30, %v737_v24 }
 0x10a   : > { %741 = vst [vmem:[%s218_s11] sm:$0xff] %v739_v31 }
 0x10b   : > { %742 = vst [vmem:[%s218_s11 + $0x8] sm:$0xff] %v740_v32 }
 0x10c   : > { %958 = shalt.err (!%p955_p5)
}
 0x10d   : > { %s959_s30 = scalar_lea.hbm %s1119_s23, 256  ;;  %s963_s6 = scalar_lea.hbm %s1169_s3, 512 }
 0x10e   : > { %p960_p6 = scmp.ne.s32.totalorder %s1119_s23, %s959_s30  ;;  %p964_p10 = scmp.lt.u32.totalorder %s1119_s23, %s1169_s3 }
 0x10f   : > { %p965_p11 = scmp.lt.u32.totalorder %s963_s6, %s959_s30  ;;  %p967_p13 = scmp.lt.u32.totalorder %s959_s30, %s1119_s23 }
 0x110   : > { %p961_p7 = pnand %p960_p6, %p1088_p4 }
 0x111   : > { %p966_p12 = por %p965_p11, %p964_p10 }
 0x112   : > { %p962_p9 = pneg %p961_p7 }
 0x113   : > { %p968_p0 = por %p967_p13, %p966_p12 }
 0x115   : > { %p969_p1 = pnand %p968_p0, %p962_p9 }
 0x117   : > { %972 = shalt.err (!%p969_p1)
}
 0x118   : > { %886 = dma.vmem_to_hbm [thread:$0]  (%p1088_p4), %s1121_s18, 256, %s1119_s23, %s744_s26  }
 0x119 PF: > { %p892_p2 = scmp.ge.s32.totalorder %s1023_s17, 2  ;;  %s772_s9 = sand.u32 1, %s1003_s12  }
 0x11a   : > { %s773_s10 = scalar_lea.sflag [#allocation4], %s772_s9 }
 0x11b   : > { %p889_p3 = pnand %p892_p2, %p1095_p8 }
 0x11d   : > { %998 = dma.done.wait (!%p889_p3), %s773_s10, 256  }
 0x11e   : > { %1000 = vsyncadd (!%p889_p3), %s773_s10, 4294967040  ;;  %s16_s17 = sadd.s32 1, %s1023_s17   ;;  %s1172_s12 = smov %s1007_s13 }
 0x11f   : > { %p13_p5 = scmp.ge.s32.totalorder %s16_s17, 4   ;;  %s1173_s13 = smov %s1011_s14 }
 0x120   : > { %s1174_s14 = smov %s1101_s25  ;;  %s1175_s15 = smov %s1019_s16 }
 0x121   : > { %s1176_s16 = smov %s1178_s20  ;;  %15 = sbr.rel (!%p13_p5) target bundleno = 4 (0x4), region = 78 }
 0x128   :  { %778 = vsyncpa [#allocation4], 1 }
 0x129   :  { %780 = vsyncpa [#allocation4 + $0x1], 1 }

// kernel: tpu_custom_call.1
= control target key start
LH: loop header
LB: loop body
LE: loop exit
PB: predicated region body
PF: predicated region fallthrough
CT: control target
= control target key end

     0   :  { %8 = vsyncpa [#allocation4], 0  ;;  %s765_s0 = inlined_call_operand.vmem [shape: f32[2,4,256], index: 0, kind: input, shape index: {}]   ;;  %s766_s1 = inlined_call_operand.vmem [shape: f32[8,4], index: 1, kind: input, shape index: {}]   ;;  %s767_s2 = inlined_call_operand.vmem [shape: f32[8,1], index: 2, kind: input, shape index: {}]   ;;  %s768_s3 = inlined_call_operand.hbm [shape: f32[2,8,256], index: 3, kind: output, shape index: {}]  }
   0x1   :  { %10 = vsyncpa [#allocation4 + $0x1], 0  ;;  %s647_s12 = smov 0   ;;  %s649_s13 = smov 0  }
   0x2   :  { %s651_s14 = smov 0   ;;  %s653_s15 = smov 0  }
   0x3   :  { %s655_s16 = smov 0   ;;  %s657_s17 = smov 0  }
   0x4 LB: > { %s466_s18 = sadd.s32 4294967295, %s622_s17   ;;  %s467_s19 = sadd.s32 4294967294, %s622_s17   ;;  %s622_s17 = sphi %s657_s17, %s16_s17   ;;  %s618_s16 = sphi %s655_s16, %s775_s16   ;;  %s614_s15 = sphi %s653_s15, %s774_s15   ;;  %s610_s14 = sphi %s651_s14, %s773_s14   ;;  %s606_s13 = sphi %s649_s13, %s772_s13   ;;  %s602_s12 = sphi %s647_s12, %s771_s12  }
   0x5   : > { %s35_s20 = sadd.s32 1, %s618_s16  ;;  %s121_s21 = sadd.s32 1, %s610_s14 }
   0x6   : > { %p37_p0 = scmp.ge.s32.totalorder %s35_s20, 2  ;;  %p131_p1 = scmp.ne.s32.totalorder %s610_s14, %s606_s13 }
   0x7   : > { %p132_p2 = scmp.eq.s32.totalorder %s466_s18, 1  ;;  %p137_p3 = scmp.ne.s32.totalorder %s606_s13, %s602_s12 }
   0x8   : > { %s777_s20 = smov (%p37_p0, %s35_s20), 0  ;;  %p138_p5 = scmp.eq.s32.totalorder %s467_s19, 1 }
   0x9   : > { %p687_p4 = por %p132_p2, %p131_p1  ;;  %s116_s23 = ssub.s32 %s618_s16, %s777_s20 }
   0xa   : > { %p471_p6 = scmp.ge.s32.totalorder %s622_s17, 1  ;;  %p119_p7 = scmp.eq.s32.totalorder %s116_s23, 0 }
   0xb   : > { %p694_p8 = por %p138_p5, %p137_p3  ;;  %p183_p9 = scmp.lt.s32.totalorder %s622_s17, 3 }
   0xc   : > { %s700_s25 = scalar_select %p119_p7, %s610_s14, %s121_s21  }
   0xd   : > { %p184_p10 = pnand %p471_p6, %p183_p9 }
   0xe   : > { %p220_p11 = scmp.lt.s32.totalorder (!%p184_p10), %s614_s15, 1  ;;  %v624_v0 = vmov (!%p184_p10), 0.0   ;;  %v625_v1 = vmov (!%p184_p10), 0   ;;  %v339_v2 = vld [vmem:[%s767_s2] sm:$0xff] (!%p184_p10)  ;;  %vm254_vm0 = vcmask (!%p184_p10), 1043456   ;;  %vm250_vm1 = vcmask (!%p184_p10), 31744  }
   0xf   : > { %187 = sbr.rel (%p184_p10) target bundleno = 260 (0x104), region = 32  ;;  %323 = vmatprep.mubr.f32.mxu0 (!%p184_p10), %v624_v0  ;;  %542 = vset.pattern.permute.xlu0 (!%p184_p10), %v625_v1  ;;  %v246_v5 = vld [vmem:[%s766_s1] sm:$0xff] (!%p184_p10)  ;;  %s216_s8 = sand.u32 (!%p184_p10), 1, %s606_s13  }
  0x10   : > { %342 = vperm.xlu0 (!%p184_p10), %542, %v339_v2   ;;  %s472_s9 = sshll.u32 (!%p184_p10), %s216_s8, 4  ;;  %s484_s10 = sshll.u32 (!%p184_p10), %s614_s15, 8 }
  0x11   : > { %s218_s11 = scalar_lea.vmem (!%p184_p10), [#allocation3], %s472_s9  ;;  %s718_s23 = scalar_lea.hbm (!%p184_p10), %s768_s3, %s484_s10 }
  0x12   : > { %s366_s18 = sshll.u32 (!%p184_p10), %s218_s11, 4  ;;  %s350_s26 = scalar_lea.sflag (!%p184_p10), [#allocation4], %s216_s8  ;;  %s720_s18 = int_to_ptr.vmem [resolvable:$true] %s366_s18 }
  0x13   : > { %s626_s27 = smov (!%p184_p10), [#allocation3]  }
  0x16   : > { %s221_s28 = scalar_select %p220_p11, %s614_s15, 1 }
  0x17   : > { %s544_s15 = scalar_lea.vmem %s720_s18, 256 }
  0x18   : > { %s483_s29 = sshll.u32 %s221_s28, 3  ;;  %p545_p12 = scmp.ne.s32.totalorder %s720_s18, %s544_s15 }
  0x19   : > { %s231_s5 = scalar_lea.vmem %s765_s0, %s483_s29  ;;  %s548_s28 = sshll.u32 %s626_s27, 4  ;;  %s549_s28 = int_to_ptr.vmem [resolvable:$false] %s548_s28 }
  0x1a   : > { %v247_v3 = vld [vmem:[%s231_s5] sm:$0xff]  ;;  %p546_p13 = pnand %p545_p12, %p687_p4  ;;  %s550_s29 = scalar_lea.vmem %s549_s28, 512 }
  0x1b   : > { %v249_v4 = vcombine.high %v247_v3, %v247_v3  ;;  %p551_p1 = scmp.lt.s32.totalorder %s720_s18, %s549_s28  ;;  %p552_p2 = scmp.lt.s32.totalorder %s550_s29, %s544_s15 }
  0x1c   : > { %p547_p0 = pneg %p546_p13 }
  0x1d   : > { %475 = vmatprep.subr.msk.mxu0 %vm254_vm0, %v249_v4  ;;  %p553_p3 = por %p552_p2, %p551_p1 }
  0x1e   : > { %476 = vmatpush1.msk.msra.mxu0 %vm254_vm0, %v247_v3 }
  0x1f   : > { %477 = vmatmul.mubr.msk.f32.vlgmr.msra.gmra.mrb[0].mxu0 %vm250_vm1, %v246_v5  ;;  %p554_p5 = pnand %p553_p3, %p547_p0 }
  0x8f   : > { %v343_v6 = vpop.permute.xlu0 %342 }
  0xf2   : > { %v325_v7 = vpop.f32.mrb[0].mxu0 }
  0xf3   : > { %v345_v8 = vadd.f32 %v343_v6, %v325_v7  ;;  %v327_v9 = vpop.f32.mrb[1].mxu0 }
  0xf4   : > { %v346_v10 = vadd.f32 %v343_v6, %v327_v9 }
  0xf5   : > { %347 = vst [vmem:[%s218_s11] sm:$0xff] %v345_v8 }
  0xf6   : > { %348 = vst [vmem:[%s218_s11 + $0x8] sm:$0xff] %v346_v10 }
  0xf7   : > { %557 = shalt.err (!%p554_p5)
}
  0xf8   : > { %s558_s30 = scalar_lea.hbm %s718_s23, 256  ;;  %s562_s6 = scalar_lea.hbm %s768_s3, 512 }
  0xf9   : > { %p559_p6 = scmp.ne.s32.totalorder %s718_s23, %s558_s30  ;;  %p563_p10 = scmp.lt.u32.totalorder %s718_s23, %s768_s3 }
  0xfa   : > { %p564_p11 = scmp.lt.u32.totalorder %s562_s6, %s558_s30  ;;  %p566_p13 = scmp.lt.u32.totalorder %s558_s30, %s718_s23 }
  0xfb   : > { %p560_p7 = pnand %p559_p6, %p687_p4 }
  0xfc   : > { %p565_p12 = por %p564_p11, %p563_p10 }
  0xfd   : > { %p561_p9 = pneg %p560_p7 }
  0xfe   : > { %p567_p0 = por %p566_p13, %p565_p12 }
 0x100   : > { %p568_p1 = pnand %p567_p0, %p561_p9 }
 0x102   : > { %571 = shalt.err (!%p568_p1)
}
 0x103   : > { %485 = dma.vmem_to_hbm [thread:$0]  (%p687_p4), %s720_s18, 256, %s718_s23, %s350_s26  }
 0x104 PF: > { %p491_p2 = scmp.ge.s32.totalorder %s622_s17, 2  ;;  %s378_s9 = sand.u32 1, %s602_s12  }
 0x105   : > { %s379_s10 = scalar_lea.sflag [#allocation4], %s378_s9 }
 0x106   : > { %p488_p3 = pnand %p491_p2, %p694_p8 }
 0x108   : > { %597 = dma.done.wait (!%p488_p3), %s379_s10, 256  }
 0x109   : > { %599 = vsyncadd (!%p488_p3), %s379_s10, 4294967040  ;;  %s16_s17 = sadd.s32 1, %s622_s17   ;;  %s771_s12 = smov %s606_s13 }
 0x10a   : > { %p13_p5 = scmp.ge.s32.totalorder %s16_s17, 4   ;;  %s772_s13 = smov %s610_s14 }
 0x10b   : > { %s773_s14 = smov %s700_s25  ;;  %s774_s15 = smov %s618_s16 }
 0x10c   : > { %s775_s16 = smov %s777_s20  ;;  %15 = sbr.rel (!%p13_p5) target bundleno = 4 (0x4), region = 78 }
 0x113   :  { %384 = vsyncpa [#allocation4], 1 }
 0x114   :  { %386 = vsyncpa [#allocation4 + $0x1], 1 }

</bundles_post_ra>
